<compile_context>
chip_gen: v7x
topology: tpu7x:2x2x1
jax: 0.10.0
libtpu: 0.0.40
codegen_flags: <defaults>
</compile_context>

<pallas_src>
import functools

import jax
import jax.numpy as jnp
from jax.experimental import pallas as pl
from jax.experimental.pallas import tpu as pltpu


def _classifier_kernel(x_ref, w1_ref, b1_ref, w2_ref, b2_ref, w3_ref, b3_ref, o_ref):
    in_dtype = x_ref.dtype
    # Linear(128 -> 64) + ReLU  (MXU matmul, f32 accumulation).
    h1 = jnp.dot(x_ref[...], w1_ref[...], preferred_element_type=jnp.float32)
    h1 = jnp.maximum(h1 + b1_ref[...].astype(jnp.float32), 0.0)
    # Keep activations in the matmul input dtype so bf16 row packing survives
    # on layers 2-3 (f32 accumulation is preserved via preferred_element_type).
    h1 = h1.astype(in_dtype)
    # Dropout(p=0.5) -> identity at inference.
    # TODO(synk): training-mode dropout would need pltpu.prng_seed + prng_random_bits masking.
    # Linear(64 -> 16) + ReLU
    h2 = jnp.dot(h1, w2_ref[...], preferred_element_type=jnp.float32)
    h2 = jnp.maximum(h2 + b2_ref[...].astype(jnp.float32), 0.0)
    h2 = h2.astype(in_dtype)
    # Linear(16 -> 10)
    logits = jnp.dot(h2, w3_ref[...], preferred_element_type=jnp.float32)
    logits = logits + b3_ref[...].astype(jnp.float32)
    o_ref[...] = logits.astype(o_ref.dtype)


def _round_up(n, m):
    return ((n + m - 1) // m) * m


def _sublane_granule(dtype):
    # f32 -> 8, bf16 -> 16, int8/fp8 -> 32 (sub-32-bit dtypes pack along sublanes).
    itemsize = jnp.dtype(dtype).itemsize
    return max(8, 32 // itemsize)


@functools.partial(jax.jit, static_argnames=("block_b",))
def classifier_forward(x, w1, b1, w2, b2, w3, b3, *, block_b=4096):
    """Forward pass of the Classifier. x: [B, 128] (f32 or bf16)."""
    B, D_IN = x.shape
    D_H1 = w1.shape[1]
    D_H2 = w2.shape[1]
    D_OUT = w3.shape[1]

    # Split the batch into near-equal tiles:
    #   * each tile is a multiple of the sublane granule for this dtype,
    #   * tiles are capped at block_b rows,
    #   * there are >= 2 tiles whenever the batch allows it (v7x has 2 TCs and
    #     dimension_semantics=("parallel",) only helps with >= 2 grid steps).
    # No jnp.pad: the ragged trailing block (if any) is bounds-masked by Pallas.
    g = _sublane_granule(x.dtype)
    n_tiles = max(1, pl.cdiv(B, block_b))
    if B >= 2 * g:
        n_tiles = max(n_tiles, 2)
    eff_block = min(_round_up(pl.cdiv(B, n_tiles), g), _round_up(block_b, g))
    eff_block = max(eff_block, g)
    grid = (pl.cdiv(B, eff_block),)

    # Weights/biases are tiny (<40 KB total) -> constant block index, so they
    # are DMA'd into VMEM once and stay resident for every grid step.
    def full(shape):
        return pl.BlockSpec(shape, lambda i: (0,) * len(shape))

    out = pl.pallas_call(
        _classifier_kernel,
        out_shape=jax.ShapeDtypeStruct((B, D_OUT), x.dtype),
        grid_spec=pltpu.PrefetchScalarGridSpec(
            num_scalar_prefetch=0,
            grid=grid,
            in_specs=[
                pl.BlockSpec((eff_block, D_IN), lambda i: (i, 0)),  # x tile
                full((D_IN, D_H1)),   # w1
                full((1, D_H1)),      # b1
                full((D_H1, D_H2)),   # w2
                full((1, D_H2)),      # b2
                full((D_H2, D_OUT)),  # w3
                full((1, D_OUT)),     # b3
            ],
            out_specs=pl.BlockSpec((eff_block, D_OUT), lambda i: (i, 0)),
        ),
        compiler_params=pltpu.CompilerParams(
            dimension_semantics=("parallel",),
            # Budget for: 2x (block_b,128) x buffers + 2x lane-padded
            # (block_b,10->128) out buffers + lane-padded h1/h2 intermediates.
            # 48 MiB leaves headroom even on v7x (64 MiB physical VMEM).
            vmem_limit_bytes=48 * 1024 * 1024,
        ),
    )(x, w1, b1, w2, b2, w3, b3)

    return out


def init_params(key):
    """Deterministic init mimicking PyTorch nn.Linear (uniform +/- 1/sqrt(fan_in)).

    Weights are stored as [in_features, out_features] (transposed relative to
    PyTorch's [out, in] convention) so the kernel uses x @ W.
    """
    dims = [(128, 64), (64, 16), (16, 10)]
    params = []
    for (fan_in, fan_out) in dims:
        key, kw, kb = jax.random.split(key, 3)
        bound = 1.0 / (fan_in ** 0.5)
        w = jax.random.uniform(kw, (fan_in, fan_out), jnp.float32, -bound, bound)
        b = jax.random.uniform(kb, (1, fan_out), jnp.float32, -bound, bound)
        params += [w, b]
    return params


def reference_forward(x, w1, b1, w2, b2, w3, b3):
    h1 = jnp.maximum(x @ w1 + b1, 0.0)
    h2 = jnp.maximum(h1 @ w2 + b2, 0.0)
    return h2 @ w3 + b3


if __name__ == "__main__":
    key = jax.random.PRNGKey(0)
    key, kx = jax.random.split(key)

    w1, b1, w2, b2, w3, b3 = init_params(key)

    # 1) Small f32 batch (not a multiple of 8) -> exercises the ragged trailing
    #    block and the ">=2 grid steps for 2 TCs" path.
    B = 12
    x = jax.random.normal(kx, (B, 128), jnp.float32)
    out = jax.block_until_ready(classifier_forward(x, w1, b1, w2, b2, w3, b3))
    ref = reference_forward(x, w1, b1, w2, b2, w3, b3)
    assert out.shape == (B, 10), out.shape
    assert jnp.allclose(out, ref, atol=1e-5, rtol=1e-5), "f32 mismatch vs reference"

    # 2) Ragged batch with a small forced tile -> exercises the multi-step grid.
    B2 = 300
    x2 = jax.random.normal(jax.random.PRNGKey(1), (B2, 128), jnp.float32)
    out2 = jax.block_until_ready(
        classifier_forward(x2, w1, b1, w2, b2, w3, b3, block_b=64))
    ref2 = reference_forward(x2, w1, b1, w2, b2, w3, b3)
    assert out2.shape == (B2, 10), out2.shape
    assert jnp.allclose(out2, ref2, atol=1e-5, rtol=1e-5), "tiled f32 mismatch"

    # 3) bf16 inputs/weights/activations (halves HBM traffic and doubles MXU
    #    row packing on every layer); f32 accumulation keeps the math stable.
    xb = x2.astype(jnp.bfloat16)
    pb = [p.astype(jnp.bfloat16) for p in (w1, b1, w2, b2, w3, b3)]
    out3 = jax.block_until_ready(classifier_forward(xb, *pb))
    assert out3.shape == (B2, 10), out3.shape
    assert jnp.allclose(out3.astype(jnp.float32), ref2, atol=0.25, rtol=0.1), "bf16 mismatch"

    print("KERNEL_OK")
</pallas_src>

<mosaic_0001>
module attributes {stable_mosaic.version = 11 : i64} {
  func.func @_classifier_kernel(%arg0: i32, %arg1: memref<16x128xf32, #tpu.memory_space<vmem>>, %arg2: memref<128x64xf32, #tpu.memory_space<vmem>>, %arg3: memref<1x64xf32, #tpu.memory_space<vmem>>, %arg4: memref<64x16xf32, #tpu.memory_space<vmem>>, %arg5: memref<1x16xf32, #tpu.memory_space<vmem>>, %arg6: memref<16x10xf32, #tpu.memory_space<vmem>>, %arg7: memref<1x10xf32, #tpu.memory_space<vmem>>, %arg8: memref<16x10xf32, #tpu.memory_space<vmem>>) attributes {dimension_semantics = [#tpu.dimension_semantics<parallel>], iteration_bounds = array<i64: 1>, scalar_prefetch = 0 : i64, scratch_operands = 0 : i64, tpu.core_type = #tpu.core_type<tc>, window_params = [{transform_indices = @transform_0, window_bounds = array<i64: 16, 128>}, {pipeline_mode = #tpu.pipeline_mode<synchronous>, transform_indices = @transform_1, window_bounds = array<i64: 128, 64>}, {pipeline_mode = #tpu.pipeline_mode<synchronous>, transform_indices = @transform_2, window_bounds = array<i64: 1, 64>}, {pipeline_mode = #tpu.pipeline_mode<synchronous>, transform_indices = @transform_3, window_bounds = array<i64: 64, 16>}, {pipeline_mode = #tpu.pipeline_mode<synchronous>, transform_indices = @transform_4, window_bounds = array<i64: 1, 16>}, {pipeline_mode = #tpu.pipeline_mode<synchronous>, transform_indices = @transform_5, window_bounds = array<i64: 16, 10>}, {pipeline_mode = #tpu.pipeline_mode<synchronous>, transform_indices = @transform_6, window_bounds = array<i64: 1, 10>}, {transform_indices = @transform_7, window_bounds = array<i64: 16, 10>}]} {
    %c0 = arith.constant 0 : index
    %c0_0 = arith.constant 0 : index
    %0 = vector.load %arg1[%c0, %c0_0] : memref<16x128xf32, #tpu.memory_space<vmem>>, vector<16x128xf32>
    %c0_1 = arith.constant 0 : index
    %c0_2 = arith.constant 0 : index
    %1 = vector.load %arg2[%c0_1, %c0_2] : memref<128x64xf32, #tpu.memory_space<vmem>>, vector<128x64xf32>
    %cst = arith.constant dense<0.000000e+00> : vector<16x64xf32>
    %2 = tpu.matmul %0, %1, %cst {dimension_numbers = #tpu.dot_dimension_numbers<[1], [0], [0], [1], [0, 0, 1, 1], [], []>} : vector<16x128xf32>, vector<128x64xf32>, vector<16x64xf32> -> vector<16x64xf32>
    %c0_3 = arith.constant 0 : index
    %c0_4 = arith.constant 0 : index
    %3 = vector.load %arg3[%c0_3, %c0_4] : memref<1x64xf32, #tpu.memory_space<vmem>>, vector<1x64xf32>
    %4 = vector.broadcast %3 : vector<1x64xf32> to vector<16x64xf32>
    %5 = arith.addf %2, %4 : vector<16x64xf32>
    %cst_5 = arith.constant 0.000000e+00 : f32
    %6 = vector.broadcast %cst_5 : f32 to vector<16x64xf32>
    %7 = arith.maximumf %5, %6 : vector<16x64xf32>
    %c0_6 = arith.constant 0 : index
    %c0_7 = arith.constant 0 : index
    %8 = vector.load %arg4[%c0_6, %c0_7] : memref<64x16xf32, #tpu.memory_space<vmem>>, vector<64x16xf32>
    %cst_8 = arith.constant dense<0.000000e+00> : vector<16x16xf32>
    %9 = tpu.matmul %7, %8, %cst_8 {dimension_numbers = #tpu.dot_dimension_numbers<[1], [0], [0], [1], [0, 0, 1, 1], [], []>} : vector<16x64xf32>, vector<64x16xf32>, vector<16x16xf32> -> vector<16x16xf32>
    %c0_9 = arith.constant 0 : index
    %c0_10 = arith.constant 0 : index
    %10 = vector.load %arg5[%c0_9, %c0_10] : memref<1x16xf32, #tpu.memory_space<vmem>>, vector<1x16xf32>
    %11 = vector.broadcast %10 : vector<1x16xf32> to vector<16x16xf32>
    %12 = arith.addf %9, %11 : vector<16x16xf32>
    %cst_11 = arith.constant 0.000000e+00 : f32
    %13 = vector.broadcast %cst_11 : f32 to vector<16x16xf32>
    %14 = arith.maximumf %12, %13 : vector<16x16xf32>
    %c0_12 = arith.constant 0 : index
    %c0_13 = arith.constant 0 : index
    %15 = vector.load %arg6[%c0_12, %c0_13] : memref<16x10xf32, #tpu.memory_space<vmem>>, vector<16x10xf32>
    %cst_14 = arith.constant dense<0.000000e+00> : vector<16x10xf32>
    %16 = tpu.matmul %14, %15, %cst_14 {dimension_numbers = #tpu.dot_dimension_numbers<[1], [0], [0], [1], [0, 0, 1, 1], [], []>} : vector<16x16xf32>, vector<16x10xf32>, vector<16x10xf32> -> vector<16x10xf32>
    %c0_15 = arith.constant 0 : index
    %c0_16 = arith.constant 0 : index
    %17 = vector.load %arg7[%c0_15, %c0_16] : memref<1x10xf32, #tpu.memory_space<vmem>>, vector<1x10xf32>
    %18 = vector.broadcast %17 : vector<1x10xf32> to vector<16x10xf32>
    %19 = arith.addf %16, %18 : vector<16x10xf32>
    %c0_17 = arith.constant 0 : index
    %c0_18 = arith.constant 0 : index
    %20 = vector.load %arg8[%c0_17, %c0_18] : memref<16x10xf32, #tpu.memory_space<vmem>>, vector<16x10xf32>
    tpu.vector_store %arg8[%c0_17, %c0_18], %19 {strides = array<i32>} : memref<16x10xf32, #tpu.memory_space<vmem>>, vector<16x10xf32>,
    return
  }
  func.func @transform_0(%arg0: i32) -> (i32, i32) {
    %c0_i32 = arith.constant 0 : i32
    %c0_i32_0 = arith.constant 0 : i32
    return %arg0, %c0_i32 : i32, i32
  }
  func.func @transform_1(%arg0: i32) -> (i32, i32) {
    %c0_i32 = arith.constant 0 : i32
    %c0_i32_0 = arith.constant 0 : i32
    %c0_i32_1 = arith.constant 0 : i32
    return %c0_i32, %c0_i32_0 : i32, i32
  }
  func.func @transform_2(%arg0: i32) -> (i32, i32) {
    %c0_i32 = arith.constant 0 : i32
    %c0_i32_0 = arith.constant 0 : i32
    %c0_i32_1 = arith.constant 0 : i32
    return %c0_i32, %c0_i32_0 : i32, i32
  }
  func.func @transform_3(%arg0: i32) -> (i32, i32) {
    %c0_i32 = arith.constant 0 : i32
    %c0_i32_0 = arith.constant 0 : i32
    %c0_i32_1 = arith.constant 0 : i32
    return %c0_i32, %c0_i32_0 : i32, i32
  }
  func.func @transform_4(%arg0: i32) -> (i32, i32) {
    %c0_i32 = arith.constant 0 : i32
    %c0_i32_0 = arith.constant 0 : i32
    %c0_i32_1 = arith.constant 0 : i32
    return %c0_i32, %c0_i32_0 : i32, i32
  }
  func.func @transform_5(%arg0: i32) -> (i32, i32) {
    %c0_i32 = arith.constant 0 : i32
    %c0_i32_0 = arith.constant 0 : i32
    %c0_i32_1 = arith.constant 0 : i32
    return %c0_i32, %c0_i32_0 : i32, i32
  }
  func.func @transform_6(%arg0: i32) -> (i32, i32) {
    %c0_i32 = arith.constant 0 : i32
    %c0_i32_0 = arith.constant 0 : i32
    %c0_i32_1 = arith.constant 0 : i32
    return %c0_i32, %c0_i32_0 : i32, i32
  }
  func.func @transform_7(%arg0: i32) -> (i32, i32) {
    %c0_i32 = arith.constant 0 : i32
    %c0_i32_0 = arith.constant 0 : i32
    return %arg0, %c0_i32 : i32, i32
  }
}

</mosaic_0001>

<bundles_post_ra>
// kernel: classifier_forward.1
= control target key start
LH: loop header
LB: loop body
LE: loop exit
PB: predicated region body
PF: predicated region fallthrough
CT: control target
= control target key end

     0   :  { %s665_s0 = inlined_call_operand.vmem [shape: f32[12,128], index: 0, kind: input, shape index: {}]   ;;  %s666_s1 = inlined_call_operand.vmem [shape: f32[128,64], index: 1, kind: input, shape index: {}]   ;;  %s667_s2 = inlined_call_operand.vmem [shape: f32[1,64], index: 2, kind: input, shape index: {}]   ;;  %s668_s3 = inlined_call_operand.vmem [shape: f32[64,16], index: 3, kind: input, shape index: {}]   ;;  %s669_s4 = inlined_call_operand.vmem [shape: f32[1,16], index: 4, kind: input, shape index: {}]   ;;  %s670_s5 = inlined_call_operand.vmem [shape: f32[16,10], index: 5, kind: input, shape index: {}]   ;;  %s671_s6 = inlined_call_operand.vmem [shape: f32[1,10], index: 6, kind: input, shape index: {}]   ;;  %s672_s7 = inlined_call_operand.hbm [shape: f32[12,10], index: 7, kind: output, shape index: {}]  }
   0x1   :  { %v29_v0 = vld [vmem:[%s666_s1] sm:$0xff]  ;;  %v30_v1 = vld [vmem:[%s666_s1 + $0x8] sm:$0xff]  ;;  %v31_v2 = vld [vmem:[%s666_s1 + $0x10] sm:$0xff] }
   0x2   :  { %v438_v3 = vpack.c.bf16 %v30_v1, %v29_v0  ;;  %v32_v4 = vld [vmem:[%s666_s1 + $0x18] sm:$0xff]  ;;  %v33_v6 = vld [vmem:[%s666_s1 + $0x20] sm:$0xff]  ;;  %v34_v7 = vld [vmem:[%s666_s1 + $0x28] sm:$0xff] }
   0x3   :  { %v442_v5 = vpack.c.bf16 %v32_v4, %v31_v2  ;;  %v446_v8 = vpack.c.bf16 %v34_v7, %v33_v6  ;;  %v35_v9 = vld [vmem:[%s666_s1 + $0x30] sm:$0xff]  ;;  %v36_v10 = vld [vmem:[%s666_s1 + $0x38] sm:$0xff]  ;;  %v27_v11 = vld [vmem:[%s665_s0] sm:$0xff] }
   0x4   :  { %439 = vmatprep.subr.bf16.mxu0 %v438_v3  ;;  %409 = vmatprep.mubr.f32.mxu0 %v27_v11  ;;  %v129_v12 = vld [vmem:[%s668_s3] sm:$0xff]  ;;  %v130_v13 = vld [vmem:[%s668_s3 + $0x8] sm:$0xff]  ;;  %v131_v14 = vld [vmem:[%s668_s3 + $0x10] sm:$0xff] }
   0x5   :  { %441 = vmatpush3.bf16.msra.mxu0 %v438_v3  ;;  %v470_v15 = vpack.c.bf16 %v130_v13, %v129_v12  ;;  %v132_v16 = vld [vmem:[%s668_s3 + $0x18] sm:$0xff]  ;;  %v133_v18 = vld [vmem:[%s668_s3 + $0x20] sm:$0xff]  ;;  %v134_v19 = vld [vmem:[%s668_s3 + $0x28] sm:$0xff] }
   0x6   :  { %443 = vmatprep.subr.bf16.mxu0 %v442_v5  ;;  %v474_v17 = vpack.c.bf16 %v132_v16, %v131_v14 }
   0x9   :  { %445 = vmatpush3.bf16.msra.mxu0 %v442_v5 }
   0xa   :  { %12 = vsyncpa [#allocation3], 0  ;;  %447 = vmatprep.subr.bf16.mxu0 %v446_v8  ;;  %v450_v20 = vpack.c.bf16 %v36_v10, %v35_v9  ;;  %471 = vmatprep.subr.bf16.mxu1 %v470_v15  ;;  %v37_v21 = vld [vmem:[%s666_s1 + $0x40] sm:$0xff]  ;;  %v38_v22 = vld [vmem:[%s666_s1 + $0x48] sm:$0xff]  ;;  %v478_v23 = vpack.c.bf16 %v134_v19, %v133_v18  ;;  %vm144_vm0 = vcmask 523264   ;;  %vm237_vm1 = vcmask 130048  }
   0xb   :  { %473 = vmatpush3.bf16.msra.mxu1 %v470_v15  ;;  %v454_v24 = vpack.c.bf16 %v38_v22, %v37_v21  ;;  %v39_v25 = vld [vmem:[%s666_s1 + $0x50] sm:$0xff]  ;;  %v40_v26 = vld [vmem:[%s666_s1 + $0x58] sm:$0xff]  ;;  %v41_v28 = vld [vmem:[%s666_s1 + $0x60] sm:$0xff]  ;;  %vm319_vm2 = vcmask 80896  }
   0xc   :  { %475 = vmatprep.subr.bf16.mxu1 %v474_v17  ;;  %v458_v27 = vpack.c.bf16 %v40_v26, %v39_v25  ;;  %v42_v29 = vld [vmem:[%s666_s1 + $0x68] sm:$0xff]  ;;  %v43_v31 = vld [vmem:[%s666_s1 + $0x70] sm:$0xff]  ;;  %v44_v32 = vld [vmem:[%s666_s1 + $0x78] sm:$0xff] }
   0xd   :  { %449 = vmatpush3.bf16.msra.mxu0 %v446_v8  ;;  %v462_v30 = vpack.c.bf16 %v42_v29, %v41_v28  ;;  %v466_v33 = vpack.c.bf16 %v44_v32, %v43_v31  ;;  %v28_v34 = vld [vmem:[%s665_s0 + $0x8] sm:$0xff]  ;;  %v135_v35 = vld [vmem:[%s668_s3 + $0x30] sm:$0xff]  ;;  %v136_v36 = vld [vmem:[%s668_s3 + $0x38] sm:$0xff] }
   0xe   :  { %451 = vmatprep.subr.bf16.mxu0 %v450_v20  ;;  %v482_v37 = vpack.c.bf16 %v136_v36, %v135_v35  ;;  %v338_v38 = vld [vmem:[%s667_s2] ss:$0 sm:$0xff]  ;;  %v229_v46 = vld [vmem:[%s670_s5 + $0x8] sm:$0xff] }
   0xf   :  { %477 = vmatpush3.bf16.msra.mxu1 %v474_v17  ;;  %v228_v45 = vld [vmem:[%s670_s5] sm:$0xff]  ;;  %s517_s5 = smov [#allocation2]  }
  0x10   :  { %479 = vmatprep.subr.bf16.mxu1 %v478_v23  ;;  %v486_v47 = vpack.c.bf16 %v229_v46, %v228_v45  ;;  %v339_v48 = vld [vmem:[%s669_s4] ss:$0 sm:$0xff]  ;;  %s327_s13 = sshll.u32 %s517_s5, 4  ;;  %s328_s13 = int_to_ptr.vmem [resolvable:$true] %s327_s13 }
  0x11   :  { %453 = vmatpush3.bf16.msra.mxu0 %v450_v20  ;;  %v342_v55 = vld [vmem:[%s671_s6] ss:$0 sm:$0xff]  ;;  %s493_s4 = scalar_lea.vmem %s328_s13, 256  ;;  %p498_p1 = scmp.lt.s32.totalorder %s328_s13, %s328_s13 }
  0x12   :  { %455 = vmatprep.subr.bf16.mxu0 %v454_v24  ;;  %p494_p0 = scmp.ne.s32.totalorder %s328_s13, %s493_s4  ;;  %p499_p2 = scmp.lt.s32.totalorder %s493_s4, %s493_s4 }
  0x13   :  { %481 = vmatpush3.bf16.msra.mxu1 %v478_v23 }
  0x14   :  { %483 = vmatprep.subr.bf16.mxu1 %v482_v37  ;;  %p500_p3 = por %p499_p2, %p498_p1 }
  0x15   :  { %457 = vmatpush3.bf16.msra.mxu0 %v454_v24 }
  0x16   :  { %459 = vmatprep.subr.bf16.mxu0 %v458_v27  ;;  %p501_p4 = pnand %p500_p3, %p494_p0 }
  0x17   :  { %485 = vmatpush3.bf16.msra.mxu1 %v482_v37 }
  0x18   :  { %487 = vmatprep.subr.bf16.mxu1 %v486_v47 }
  0x19   :  { %461 = vmatpush3.bf16.msra.mxu0 %v458_v27 }
  0x1a   :  { %463 = vmatprep.subr.bf16.mxu0 %v462_v30 }
  0x1d   :  { %465 = vmatpush3.bf16.msra.mxu0 %v462_v30 }
  0x1e   :  { %467 = vmatprep.subr.bf16.mxu0 %v466_v33 }
  0x21   :  { %469 = vmatpush3.bf16.msra.mxu0 %v466_v33 }
  0x24   :  { %410 = vmatmul.mubr.f32.vlgmr.msra.gmra.mrb[0].mxu0 %v28_v34 }
  0xf7   :  { %v411_v39 = vpop.f32.mrb[0].mxu0 }
  0xf8   :  { %v124_v40 = vadd.f32 %v411_v39, %v338_v38  ;;  %v118_v41 = vpop.f32.mrb[1].mxu0 }
  0xf9   :  { %v119_v42 = vadd.f32 %v338_v38, %v118_v41 }
  0xfa   :  { %v128_v44 = vmax.f32 %v124_v40, 0.0 }
  0xfb   :  { %v127_v43 = vmax.f32 %v119_v42, 0.0 }
  0xfd   :  { %428 = vmatprep.mubr.msk.f32.mxu1 %vm144_vm0, %v127_v43 }
  0xfe   :  { %429 = vmatmul.mubr.msk.f32.vlgmr.msra.gmra.mrb[0].mxu1 %vm144_vm0, %v128_v44 }
  0xff   :  { %489 = vmatpush3.bf16.msra.mxu1 %v486_v47 }
 0x1d1   :  { %v430_v49 = vpop.f32.mrb[0].mxu1 }
 0x1d2   :  { %v223_v50 = vadd.f32 %v430_v49, %v339_v48  ;;  %v217_v51 = vpop.f32.mrb[1].mxu1 }
 0x1d3   :  { %v218_v52 = vadd.f32 %v339_v48, %v217_v51 }
 0x1d4   :  { %v227_v54 = vmax.f32 %v223_v50, 0.0 }
 0x1d5   :  { %v226_v53 = vmax.f32 %v218_v52, 0.0 }
 0x1d7   :  { %435 = vmatprep.mubr.msk.f32.mxu1 %vm237_vm1, %v226_v53 }
 0x1d8   :  { %436 = vmatmul.mubr.msk.f32.vlgmr.msra.gmra.mrb[2].mxu1 %vm237_vm1, %v227_v54 }
 0x2ab   :  { %v437_v56 = vpop.f32.mrb[2].mxu1 }
 0x2ac   :  { %v316_v57 = vadd.f32 %v437_v56, %v342_v55  ;;  %v310_v58 = vpop.f32.mrb[3].mxu1 }
 0x2ad   :  { %v311_v59 = vadd.f32 %v342_v55, %v310_v58 }
 0x2ae   :  { %321 = vst.msk [vmem:[#allocation2 + $0x8] sm:$0xff] %vm319_vm2, %v316_v57 }
 0x2af   :  { %320 = vst.msk [vmem:[#allocation2] sm:$0xff] %vm319_vm2, %v311_v59 }
 0x2b0   :  { %504 = shalt.err (!%p501_p4)
}
 0x2b1   :  { %s505_s6 = scalar_lea.hbm %s672_s7, 256 }
 0x2b2   :  { %p506_p5 = scmp.ne.s32.totalorder %s672_s7, %s505_s6  ;;  %p509_p6 = scmp.lt.u32.totalorder %s505_s6, %s672_s7 }
 0x2b4   :  { %p511_p7 = pnand %p509_p6, %p506_p5 }
 0x2b6   :  { %514 = shalt.err (!%p511_p7)
}
 0x2b7   :  { %s518_s20 = smov 128   ;;  %s519_s21 = smov 8  }
 0x2b8   :  { %333 = dma.vmem_to_hbm [thread:$0]  %s328_s13, 256, %s672_s7, [#allocation3], %s518_s20, %s518_s20, %s519_s21  }
 0x2b9   :  { %515 = dma.done.wait [#allocation3], 256  }
 0x2ba   :  { %516 = vsyncadd [#allocation3], 4294967040 }
 0x2bb   :  { %337 = vsyncpa [#allocation3], 1 }

</bundles_post_ra>
